<compile_context>
chip_gen: v7x
topology: tpu7x:2x2x1
jax: 0.10.0
libtpu: 0.0.40
codegen_flags: <defaults>
</compile_context>

<pallas_src>
import jax
import jax.numpy as jnp
from jax.experimental import pallas as pl
from jax.experimental.pallas import tpu as pltpu

EPS = 1e-5          # nn.BatchNorm2d default eps
BF16 = jnp.bfloat16
F32 = jnp.float32


def _round_up(v, m):
    return -(-v // m) * m


def _blk_bytes(rows, cols, itemsize):
    return _round_up(max(rows, 1), 8) * _round_up(max(cols, 1), 128) * itemsize


def _compiler_params(est_bytes):
    """parallel grid axis (megacore on v7x); raise scoped VMEM only if needed,
    clamped against the device's physical VMEM."""
    kwargs = dict(dimension_semantics=("parallel",))
    if est_bytes > 32 * 2 ** 20:                       # default scoped limit
        try:
            cap = pltpu.get_tpu_info().vmem_capacity_bytes
        except Exception:                              # pragma: no cover
            cap = 64 * 2 ** 20                         # v7x floor
        kwargs["vmem_limit_bytes"] = int(min(1.25 * est_bytes, 0.8 * cap))
    return pltpu.CompilerParams(**kwargs)


# ----------------------------------------------------------------------------
# Kernels
# ----------------------------------------------------------------------------
def _conv1x1_stats_kernel(x_ref, w_ref, o_ref, s_ref, q_ref):
    # conv1 (1x1) as a matmul; emit bf16 activations + per-block BN partials.
    y = jnp.dot(x_ref[...], w_ref[...], preferred_element_type=F32)
    o_ref[...] = y.astype(BF16)
    s_ref[...] = jnp.sum(y, axis=0, keepdims=True).reshape(1, 1, -1)
    q_ref[...] = jnp.sum(y * y, axis=0, keepdims=True).reshape(1, 1, -1)


def _bn_conv1x1_stats_kernel(x_ref, sc_ref, bi_ref, w_ref, o_ref, s_ref, q_ref):
    # bn apply + relu (f32) -> conv3 (1x1) matmul -> bf16 out + BN partials.
    a = jnp.maximum(x_ref[...].astype(F32) * sc_ref[...] + bi_ref[...], 0.0)
    y = jnp.dot(a.astype(BF16), w_ref[...], preferred_element_type=F32)
    o_ref[...] = y.astype(BF16)
    s_ref[...] = jnp.sum(y, axis=0, keepdims=True).reshape(1, 1, -1)
    q_ref[...] = jnp.sum(y * y, axis=0, keepdims=True).reshape(1, 1, -1)


def _bn_residual_relu_kernel(y_ref, sc_ref, bi_ref, x_ref, o_ref):
    # bn3 apply + residual add + relu (f32 output).
    y = y_ref[...].astype(F32) * sc_ref[...] + bi_ref[...]
    o_ref[...] = jnp.maximum(y + x_ref[...].astype(F32), 0.0)


def _make_conv3x3_stats_kernel(H, W, width, P):
    NB = H * W
    CK = 3 * width

    def kernel(x_ref, sc_ref, bi_ref, w_ref, ml_ref, mr_ref,
               o_ref, s_ref, q_ref, pad_ref):
        # bn1 apply + relu (f32).
        a = jnp.maximum(x_ref[...].astype(F32) * sc_ref[...] + bi_ref[...], 0.0)

        # Zero the y-halo rows; with one image per block every dy=+/-1 window
        # row that leaves the image lands in this halo, so no y-mask is needed.
        pad_ref[0:P, :] = jnp.zeros((P, CK), BF16)
        pad_ref[P + NB:2 * P + NB, :] = jnp.zeros((P, CK), BF16)

        # Stage the three dx slabs at the SAME aligned row range [P, P+NB):
        #   cols [0,  w): a[r-1] (dx=-1), masked at the left image edge
        #   cols [w, 2w): a[r]
        #   cols [2w,3w): a[r+1] (dx=+1), masked at the right image edge
        # The dx shift is a sublane roll (XLU); its wrap-around row is already
        # zeroed by the x-mask, so all stores stay 8-row aligned.
        pad_ref[P:P + NB, 0:width] = \
            pltpu.roll(a * ml_ref[...], 1, 0).astype(BF16)
        pad_ref[P:P + NB, width:2 * width] = a.astype(BF16)
        pad_ref[P:P + NB, 2 * width:CK] = \
            pltpu.roll(a * mr_ref[...], NB - 1, 0).astype(BF16)

        # 3 matmuls with K = 3*width (vs 9 with K = width); a plain sum of dots
        # (no elementwise between taps) so the MXU result buffer can accumulate.
        acc = jnp.dot(pad_ref[P - W:P - W + NB, :], w_ref[0],
                      preferred_element_type=F32)
        acc = acc + jnp.dot(pad_ref[P:P + NB, :], w_ref[1],
                            preferred_element_type=F32)
        acc = acc + jnp.dot(pad_ref[P + W:P + W + NB, :], w_ref[2],
                            preferred_element_type=F32)

        o_ref[...] = acc.astype(BF16)
        s_ref[...] = jnp.sum(acc, axis=0, keepdims=True).reshape(1, 1, -1)
        q_ref[...] = jnp.sum(acc * acc, axis=0, keepdims=True).reshape(1, 1, -1)

    return kernel


# ----------------------------------------------------------------------------
# Wrapper
# ----------------------------------------------------------------------------
def bottleneck_prim_forward(x_nchw, params):
    N, Cin, H, W = map(int, x_nchw.shape)
    width = int(params["w1"].shape[1])
    Cout = int(params["w3"].shape[1])
    assert Cin == Cout, "identity add requires inplanes == planes * expansion"
    NB = H * W                       # rows per image == rows per grid block
    NHW = N * NB
    assert NB % 8 == 0, "H*W must be a multiple of 8 (sublane tiling)"
    P = _round_up(W, 8)              # y-halo rows per side (>= W, 8-aligned)

    # NCHW -> NHWC -> (N*H*W, C); cast to bf16 once (conv1 input + residual).
    x_flat = jnp.transpose(x_nchw, (0, 2, 3, 1)).reshape(NHW, Cin).astype(BF16)

    w1 = params["w1"].astype(BF16)                                 # (Cin, width)
    # conv2 HWIO (3,3,width,width) -> per-ky weights with kx folded into K:
    # (3, 3*width, width), K index = kx*width + cin (matches the slab order).
    w2k = params["w2"].astype(BF16).reshape(3, 3 * width, width)
    w3 = params["w3"].astype(BF16)                                 # (width, Cout)

    # x-boundary masks for the conv2 dx slabs (per image, identical per block).
    col = jnp.arange(NB, dtype=jnp.int32) % W
    m_left = (col != (W - 1)).astype(F32).reshape(NB, 1)   # source mask, dx=-1
    m_right = (col != 0).astype(F32).reshape(NB, 1)        # source mask, dx=+1

    grid = (N,)

    def row(C):
        return pl.BlockSpec((NB, C), lambda i: (i, 0))

    def const2(r, c):
        return pl.BlockSpec((r, c), lambda i: (0, 0))

    def stat(C):
        return pl.BlockSpec((1, 1, C), lambda i: (i, 0, 0))

    def stat_shape(C):
        return jax.ShapeDtypeStruct((N, 1, C), F32)

    def fold_bn(s_parts, q_parts, g, b):
        # Training-mode BN (biased variance over N*H*W) folded to scale/bias.
        s = jnp.sum(s_parts, axis=0)                       # (1, C)
        q = jnp.sum(q_parts, axis=0)
        mean = s / NHW
        var = q / NHW - mean * mean
        scale = g * jax.lax.rsqrt(var + EPS)
        return scale, b - mean * scale

    # ---- pass 1: conv1 (1x1) + bn1 partial stats ---------------------------
    est1 = (2 * (_blk_bytes(NB, Cin, 2) + _blk_bytes(NB, width, 2))
            + _blk_bytes(Cin, width, 2) + 4 * _blk_bytes(NB, width, 4)
            + (1 << 20))
    out1, s1p, q1p = pl.pallas_call(
        _conv1x1_stats_kernel,
        grid=grid,
        in_specs=[row(Cin), const2(Cin, width)],
        out_specs=[row(width), stat(width), stat(width)],
        out_shape=[jax.ShapeDtypeStruct((NHW, width), BF16),
                   stat_shape(width), stat_shape(width)],
        compiler_params=_compiler_params(est1),
    )(x_flat, w1)
    s1, b1 = fold_bn(s1p, q1p, params["g1"], params["b1"])

    # ---- pass 2: bn1+relu, conv2 (3x3, kx-folded) + bn2 partial stats ------
    est2 = (4 * _blk_bytes(NB, width, 2)
            + _blk_bytes(2 * P + NB, 3 * width, 2)
            + 3 * _blk_bytes(3 * width, width, 2)
            + 2 * _blk_bytes(NB, 1, 4)
            + 6 * _blk_bytes(NB, 3 * width, 4) + (1 << 20))
    out4, s2p, q2p = pl.pallas_call(
        _make_conv3x3_stats_kernel(H, W, width, P),
        grid=grid,
        in_specs=[row(width), const2(1, width), const2(1, width),
                  pl.BlockSpec((3, 3 * width, width), lambda i: (0, 0, 0)),
                  const2(NB, 1), const2(NB, 1)],
        out_specs=[row(width), stat(width), stat(width)],
        out_shape=[jax.ShapeDtypeStruct((NHW, width), BF16),
                   stat_shape(width), stat_shape(width)],
        scratch_shapes=[pltpu.VMEM((2 * P + NB, 3 * width), BF16)],
        compiler_params=_compiler_params(est2),
    )(out1, s1, b1, w2k, m_left, m_right)
    s2, b2 = fold_bn(s2p, q2p, params["g2"], params["b2"])

    # ---- pass 3: bn2+relu, conv3 (1x1) + bn3 partial stats -----------------
    est3 = (2 * (_blk_bytes(NB, width, 2) + _blk_bytes(NB, Cout, 2))
            + _blk_bytes(width, Cout, 2) + 4 * _blk_bytes(NB, Cout, 4)
            + (1 << 20))
    out7, s3p, q3p = pl.pallas_call(
        _bn_conv1x1_stats_kernel,
        grid=grid,
        in_specs=[row(width), const2(1, width), const2(1, width),
                  const2(width, Cout)],
        out_specs=[row(Cout), stat(Cout), stat(Cout)],
        out_shape=[jax.ShapeDtypeStruct((NHW, Cout), BF16),
                   stat_shape(Cout), stat_shape(Cout)],
        compiler_params=_compiler_params(est3),
    )(out4, s2, b2, w3)
    s3, b3 = fold_bn(s3p, q3p, params["g3"], params["b3"])

    # ---- pass 4: bn3 + residual add + relu ---------------------------------
    est4 = (2 * (2 * _blk_bytes(NB, Cout, 2) + _blk_bytes(NB, Cout, 4))
            + (1 << 20))
    out_flat = pl.pallas_call(
        _bn_residual_relu_kernel,
        grid=grid,
        in_specs=[row(Cout), const2(1, Cout), const2(1, Cout), row(Cin)],
        out_specs=row(Cout),
        out_shape=jax.ShapeDtypeStruct((NHW, Cout), F32),
        compiler_params=_compiler_params(est4),
    )(out7, s3, b3, x_flat)

    # (NHW, C) -> NHWC -> NCHW
    return jnp.transpose(out_flat.reshape(N, H, W, Cout), (0, 3, 1, 2))


# ----------------------------------------------------------------------------
# Params / reference
# ----------------------------------------------------------------------------
def init_params(key, inplanes, planes, base_width=64, groups=1):
    width = int(planes * (base_width / 64.0)) * groups
    cout = planes * 4  # expansion = 4
    ks = jax.random.split(key, 9)
    return {
        # conv1: torch OIHW (width, inplanes, 1, 1) -> stored (inplanes, width)
        "w1": 0.1 * jax.random.normal(ks[0], (inplanes, width), F32),
        "g1": 1.0 + 0.1 * jax.random.normal(ks[1], (1, width), F32),
        "b1": 0.1 * jax.random.normal(ks[2], (1, width), F32),
        # conv2: torch OIHW (width, width, 3, 3) -> stored HWIO (3,3,width,width)
        "w2": 0.1 * jax.random.normal(ks[3], (3, 3, width, width), F32),
        "g2": 1.0 + 0.1 * jax.random.normal(ks[4], (1, width), F32),
        "b2": 0.1 * jax.random.normal(ks[5], (1, width), F32),
        # conv3: torch OIHW (cout, width, 1, 1) -> stored (width, cout)
        "w3": 0.1 * jax.random.normal(ks[6], (width, cout), F32),
        "g3": 1.0 + 0.1 * jax.random.normal(ks[7], (1, cout), F32),
        "b3": 0.1 * jax.random.normal(ks[8], (1, cout), F32),
    }


def reference_forward(x_nchw, params):
    """Pure-JAX reference (mirrors the PyTorch module, training-mode BN) with
    the same precision policy as the kernels: bf16 matmul operands, bf16 HBM
    intermediates, f32 statistics / elementwise math."""
    x = jnp.transpose(x_nchw, (0, 2, 3, 1)).astype(BF16)   # NHWC bf16

    def bn_apply(y, g, b):
        n = y.shape[0] * y.shape[1] * y.shape[2]
        s = jnp.sum(y, axis=(0, 1, 2), keepdims=True)
        q = jnp.sum(y * y, axis=(0, 1, 2), keepdims=True)
        mean = s / n
        var = q / n - mean * mean
        scale = g.reshape(1, 1, 1, -1) * jax.lax.rsqrt(var + EPS)
        bias = b.reshape(1, 1, 1, -1) - mean * scale
        yq = y.astype(BF16).astype(F32)       # bf16 HBM intermediate
        return yq * scale + bias

    w1 = params["w1"].astype(BF16)
    w2 = params["w2"].astype(BF16)
    w3 = params["w3"].astype(BF16)

    y1 = jnp.einsum("nhwc,cd->nhwd", x, w1, preferred_element_type=F32)
    a1 = jnp.maximum(bn_apply(y1, params["g1"], params["b1"]), 0.0).astype(BF16)
    y2 = jax.lax.conv_general_dilated(
        a1, w2, window_strides=(1, 1), padding="SAME",
        dimension_numbers=("NHWC", "HWIO", "NHWC"),
        preferred_element_type=F32)
    a2 = jnp.maximum(bn_apply(y2, params["g2"], params["b2"]), 0.0).astype(BF16)
    y3 = jnp.einsum("nhwc,cd->nhwd", a2, w3, preferred_element_type=F32)
    out = jnp.maximum(bn_apply(y3, params["g3"], params["b3"]) + x.astype(F32),
                      0.0)
    return jnp.transpose(out, (0, 3, 1, 2))


if __name__ == "__main__":
    key = jax.random.PRNGKey(0)
    k_x, k_p = jax.random.split(key)

    # inplanes must equal planes * expansion for the identity (no-downsample) path.
    N, H, W = 2, 16, 16
    planes = 8
    inplanes = planes * 4            # 32

    x = jax.random.normal(k_x, (N, inplanes, H, W), jnp.float32)
    params = init_params(k_p, inplanes, planes)

    out = jax.block_until_ready(bottleneck_prim_forward(x, params))
    ref = reference_forward(x, params)

    assert out.shape == ref.shape == (N, inplanes, H, W)
    max_err = float(jnp.max(jnp.abs(out - ref)))
    # Kernel and reference share the bf16 matmul / bf16 intermediate policy.
    assert jnp.allclose(out, ref, atol=2e-2, rtol=2e-2), max_err

    print("KERNEL_OK")
</pallas_src>

<mosaic_0001>
module attributes {stable_mosaic.version = 11 : i64} {
  func.func @_conv1x1_stats_kernel(%arg0: i32, %arg1: memref<256x32xbf16, #tpu.memory_space<vmem>>, %arg2: memref<32x8xbf16, #tpu.memory_space<vmem>>, %arg3: memref<256x8xbf16, #tpu.memory_space<vmem>>, %arg4: memref<1x1x8xf32, #tpu.memory_space<vmem>>, %arg5: memref<1x1x8xf32, #tpu.memory_space<vmem>>) attributes {dimension_semantics = [#tpu.dimension_semantics<parallel>], iteration_bounds = array<i64: 2>, scalar_prefetch = 0 : i64, scratch_operands = 0 : i64, tpu.core_type = #tpu.core_type<tc>, window_params = [{transform_indices = @transform_0, window_bounds = array<i64: 256, 32>}, {pipeline_mode = #tpu.pipeline_mode<synchronous>, transform_indices = @transform_1, window_bounds = array<i64: 32, 8>}, {transform_indices = @transform_2, window_bounds = array<i64: 256, 8>}, {transform_indices = @transform_3, window_bounds = array<i64: 1, 1, 8>}, {transform_indices = @transform_4, window_bounds = array<i64: 1, 1, 8>}]} {
    %c0 = arith.constant 0 : index
    %c0_0 = arith.constant 0 : index
    %0 = vector.load %arg1[%c0, %c0_0] : memref<256x32xbf16, #tpu.memory_space<vmem>>, vector<256x32xbf16>
    %c0_1 = arith.constant 0 : index
    %c0_2 = arith.constant 0 : index
    %1 = vector.load %arg2[%c0_1, %c0_2] : memref<32x8xbf16, #tpu.memory_space<vmem>>, vector<32x8xbf16>
    %cst = arith.constant dense<0.000000e+00> : vector<256x8xf32>
    %2 = tpu.matmul %0, %1, %cst {dimension_numbers = #tpu.dot_dimension_numbers<[1], [0], [0], [1], [0, 0, 1, 1], [], []>} : vector<256x32xbf16>, vector<32x8xbf16>, vector<256x8xf32> -> vector<256x8xf32>
    %3 = arith.truncf %2 : vector<256x8xf32> to vector<256x8xbf16>
    %c0_3 = arith.constant 0 : index
    %c0_4 = arith.constant 0 : index
    %4 = vector.load %arg3[%c0_3, %c0_4] : memref<256x8xbf16, #tpu.memory_space<vmem>>, vector<256x8xbf16>
    tpu.vector_store %arg3[%c0_3, %c0_4], %3 {strides = array<i32>} : memref<256x8xbf16, #tpu.memory_space<vmem>>, vector<256x8xbf16>,
    %cst_5 = arith.constant dense<0.000000e+00> : vector<8xf32>
    %5 = vector.multi_reduction <add>, %2, %cst_5 [0] : vector<256x8xf32> to vector<8xf32>
    %6 = vector.shape_cast %5 : vector<8xf32> to vector<1x8xf32>
    %7 = vector.shape_cast %6 : vector<1x8xf32> to vector<1x1x8xf32>
    %c0_6 = arith.constant 0 : index
    %c0_7 = arith.constant 0 : index
    %c0_8 = arith.constant 0 : index
    %8 = vector.load %arg4[%c0_6, %c0_7, %c0_8] : memref<1x1x8xf32, #tpu.memory_space<vmem>>, vector<1x1x8xf32>
    tpu.vector_store %arg4[%c0_6, %c0_7, %c0_8], %7 {strides = array<i32>} : memref<1x1x8xf32, #tpu.memory_space<vmem>>, vector<1x1x8xf32>,
    %9 = arith.mulf %2, %2 : vector<256x8xf32>
    %cst_9 = arith.constant dense<0.000000e+00> : vector<8xf32>
    %10 = vector.multi_reduction <add>, %9, %cst_9 [0] : vector<256x8xf32> to vector<8xf32>
    %11 = vector.shape_cast %10 : vector<8xf32> to vector<1x8xf32>
    %12 = vector.shape_cast %11 : vector<1x8xf32> to vector<1x1x8xf32>
    %c0_10 = arith.constant 0 : index
    %c0_11 = arith.constant 0 : index
    %c0_12 = arith.constant 0 : index
    %13 = vector.load %arg5[%c0_10, %c0_11, %c0_12] : memref<1x1x8xf32, #tpu.memory_space<vmem>>, vector<1x1x8xf32>
    tpu.vector_store %arg5[%c0_10, %c0_11, %c0_12], %12 {strides = array<i32>} : memref<1x1x8xf32, #tpu.memory_space<vmem>>, vector<1x1x8xf32>,
    return
  }
  func.func @transform_0(%arg0: i32) -> (i32, i32) {
    %c0_i32 = arith.constant 0 : i32
    %c0_i32_0 = arith.constant 0 : i32
    return %arg0, %c0_i32 : i32, i32
  }
  func.func @transform_1(%arg0: i32) -> (i32, i32) {
    %c0_i32 = arith.constant 0 : i32
    %c0_i32_0 = arith.constant 0 : i32
    %c0_i32_1 = arith.constant 0 : i32
    return %c0_i32, %c0_i32_0 : i32, i32
  }
  func.func @transform_2(%arg0: i32) -> (i32, i32) {
    %c0_i32 = arith.constant 0 : i32
    %c0_i32_0 = arith.constant 0 : i32
    return %arg0, %c0_i32 : i32, i32
  }
  func.func @transform_3(%arg0: i32) -> (i32, i32, i32) {
    %c0_i32 = arith.constant 0 : i32
    %c0_i32_0 = arith.constant 0 : i32
    %c0_i32_1 = arith.constant 0 : i32
    return %arg0, %c0_i32, %c0_i32_0 : i32, i32, i32
  }
  func.func @transform_4(%arg0: i32) -> (i32, i32, i32) {
    %c0_i32 = arith.constant 0 : i32
    %c0_i32_0 = arith.constant 0 : i32
    %c0_i32_1 = arith.constant 0 : i32
    return %arg0, %c0_i32, %c0_i32_0 : i32, i32, i32
  }
}

</mosaic_0001>

<bundles_post_ra>
// kernel: tpu_custom_call.1
= control target key start
LH: loop header
LB: loop body
LE: loop exit
PB: predicated region body
PF: predicated region fallthrough
CT: control target
= control target key end

     0   :  { %10 = vsyncpa [#allocation3], 0  ;;  %s1825_s0 = inlined_call_operand.vmem [shape: bf16[512,32], index: 0, kind: input, shape index: {}]   ;;  %s1826_s1 = inlined_call_operand.vmem [shape: bf16[32,8], index: 1, kind: input, shape index: {}]   ;;  %s1827_s2 = inlined_call_operand.vmem [shape: bf16[512,8], index: 2, kind: output, shape index: {0}]   ;;  %s1828_s3 = inlined_call_operand.hbm [shape: f32[2,1,8], index: 3, kind: output, shape index: {1}]   ;;  %s1829_s4 = inlined_call_operand.hbm [shape: f32[2,1,8], index: 4, kind: output, shape index: {2}]  }
   0x1   :  { %12 = vsyncpa [#allocation3 + $0x1], 0 }
   0x2   :  { %13 = vsyncpa [#allocation5], 0 }
   0x3   :  { %15 = vsyncpa [#allocation5 + $0x1], 0  ;;  %s1394_s15 = smov 0   ;;  %s1396_s16 = smov 0  }
   0x4   :  { %s1398_s17 = smov 0   ;;  %s1400_s18 = smov 0  }
   0x5 LB: > { %s1415_s19 = sadd.s32 4294967295, %s1365_s18   ;;  %s1041_s20 = sadd.s32 4294967294, %s1365_s18   ;;  %s1365_s18 = sphi %s1400_s18, %s1835_s18   ;;  %s1361_s17 = sphi %s1398_s17, %s1834_s17   ;;  %s1357_s16 = sphi %s1396_s16, %s1833_s16   ;;  %s1353_s15 = sphi %s1394_s15, %s1832_s15  }
   0x6   : > { %s1419_s21 = sadd.s32 1, %s1365_s18   ;;  %s101_s22 = sadd.s32 1, %s1361_s17 }
   0x7   : > { %s98_s23 = ssub.s32 %s1365_s18, %s1419_s21  ;;  %p111_p0 = scmp.ne.s32.totalorder %s1361_s17, %s1357_s16 }
   0x8   : > { %p99_p1 = scmp.eq.s32.totalorder %s98_s23, 0  ;;  %p112_p2 = scmp.eq.s32.totalorder %s1415_s19, 1 }
   0x9   : > { %p117_p3 = scmp.ne.s32.totalorder %s1357_s16, %s1353_s15  ;;  %p118_p4 = scmp.eq.s32.totalorder %s1041_s20, 1 }
   0xa   : > { %s1430_s24 = scalar_select %p99_p1, %s1361_s17, %s101_s22  }
   0xb   : > { %p1432_p5 = por %p112_p2, %p111_p0  ;;  %p1436_p6 = por %p118_p4, %p117_p3 }
   0xc   : > { %p1044_p7 = scmp.ge.s32.totalorder %s1365_s18, 1  ;;  %p174_p8 = scmp.lt.s32.totalorder %s1365_s18, 3 }
   0xe   : > { %p175_p9 = pnand %p1044_p7, %p174_p8 }
   0xf   : > { %v1253_v0 = vld [vmem:[%s1826_s1] sm:$0xff] (!%p175_p9)   ;;  %s1045_s29 = sshll.u32 (!%p175_p9), %s1415_s19, 5  ;;  %v1254_v1 = vld [vmem:[%s1826_s1 + $0x8] sm:$0xff] (!%p175_p9)   ;;  %vm349_vm0 = vcmask (!%p175_p9), 261120   ;;  %vm687_vm1 = vcmask (!%p175_p9), 60416   ;;  %vm720_vm2 = vcmask (!%p175_p9), 64512  }
  0x10   : > { %178 = sbr.rel (%p175_p9) target bundleno = 355 (0x163), region = 28  ;;  %p209_p10 = scmp.lt.s32.totalorder (!%p175_p9), %s1045_s29, 63  ;;  %1169 = vmatprep.subr.bf16.mxu0 (!%p175_p9), %v1253_v0  ;;  %1205 = vmatprep.subr.bf16.mxu1 (!%p175_p9), %v1253_v0  ;;  %vm790_vm3 = vcmask (!%p175_p9), 57344  }
  0x11   : > { %1170 = vmatpush3.bf16.msra.mxu0 (!%p175_p9), %v1253_v0  ;;  %1207 = vmatpush3.bf16.msra.mxu1 (!%p175_p9), %v1253_v0  ;;  %s1739_s13 = sand.u32 (!%p175_p9), 1, %s1357_s16   ;;  %s1115_s14 = sshll.u32 (!%p175_p9), %s1415_s19, 4 }
  0x12   : > { %1171 = vmatprep.subr.bf16.mxu0 (!%p175_p9), %v1254_v1  ;;  %1206 = vmatprep.subr.bf16.mxu1 (!%p175_p9), %v1254_v1  ;;  %s201_s20 = scalar_lea.vmem (!%p175_p9), [#allocation2], %s1739_s13  ;;  %s207_s23 = scalar_lea.vmem (!%p175_p9), [#allocation4], %s1739_s13 }
  0x13   : > { %s920_s22 = sshll.u32 (!%p175_p9), %s201_s20, 4  ;;  %s933_s27 = sshll.u32 (!%p175_p9), %s207_s23, 4  ;;  %s1751_s22 = int_to_ptr.vmem [resolvable:$true] %s920_s22  ;;  %s1759_s27 = int_to_ptr.vmem [resolvable:$true] %s933_s27 }
  0x14   : > { %s1749_s30 = scalar_lea.hbm (!%p175_p9), %s1828_s3, %s1115_s14  ;;  %s900_s7 = scalar_lea.sflag (!%p175_p9), [#allocation3], %s1739_s13 }
  0x15   : > { %1172 = vmatpush3.bf16.msra.mxu0 (!%p175_p9), %v1254_v1  ;;  %1208 = vmatpush3.bf16.msra.mxu1 (!%p175_p9), %v1254_v1  ;;  %s1271_s8 = scalar_lea.vmem (!%p175_p9), %s1751_s22, 16 }
  0x16   : > { %p1272_p11 = scmp.ne.s32.totalorder (!%p175_p9), %s1751_s22, %s1271_s8 }
  0x17   : > { %s1837_s29 = smov (!%p209_p10, %s1045_s29), 63 }
  0x18   : > { %s1046_s6 = sshll.u32 %s1837_s29, 2  ;;  %p1273_p12 = pnand %p1272_p11, %p1432_p5 }
  0x19   : > { %s1457_s9 = scalar_lea.vmem %s1825_s0, %s1046_s6  ;;  %s1496_s12 = scalar_lea.vmem %s1827_s2, %s1046_s6 }
  0x1a   : > { %v1255_v2 = vld [vmem:[%s1457_s9] sm:$0xff]   ;;  %v1256_v3 = vld [vmem:[%s1457_s9 + $0x8] sm:$0xff]   ;;  %v1257_v4 = vld [vmem:[%s1457_s9 + $0x10] sm:$0xff]   ;;  %s1757_s6 = scalar_lea.hbm %s1829_s4, %s1115_s14  ;;  %p1274_p13 = pneg %p1273_p12 }
  0x1b   : > { %1173 = vmatprep.mubr.msk.bf16.mxu0 %vm349_vm0, %v1255_v2  ;;  %v1258_v5 = vld [vmem:[%s1457_s9 + $0x18] sm:$0xff]   ;;  %v1259_v6 = vld [vmem:[%s1457_s9 + $0x20] sm:$0xff]   ;;  %v1264_v8 = vld [vmem:[%s1457_s9 + $0x48] sm:$0xff]  }
  0x1c   : > { %1174 = vmatmul.mubr.msk.bf16.vlgmr.msra.gmra.mrb[0].mxu0 %vm349_vm0, %v1256_v3  ;;  %v1263_v7 = vld [vmem:[%s1457_s9 + $0x40] sm:$0xff]   ;;  %v1265_v9 = vld [vmem:[%s1457_s9 + $0x50] sm:$0xff]   ;;  %v1260_v10 = vld [vmem:[%s1457_s9 + $0x28] sm:$0xff]  }
  0x1d   : > { %1177 = vmatprep.mubr.msk.bf16.mxu0 %vm349_vm0, %v1257_v4  ;;  %1189 = vmatprep.mubr.msk.bf16.mxu1 %vm349_vm0, %v1263_v7  ;;  %v1266_v11 = vld [vmem:[%s1457_s9 + $0x58] sm:$0xff]   ;;  %v1261_v12 = vld [vmem:[%s1457_s9 + $0x30] sm:$0xff]   ;;  %v1267_v13 = vld [vmem:[%s1457_s9 + $0x60] sm:$0xff]  }
  0x1e   : > { %1190 = vmatmul.mubr.msk.bf16.vlgmr.msra.gmra.mrb[0].mxu1 %vm349_vm0, %v1264_v8  ;;  %v1262_v14 = vld [vmem:[%s1457_s9 + $0x38] sm:$0xff]   ;;  %v1268_v15 = vld [vmem:[%s1457_s9 + $0x68] sm:$0xff]   ;;  %v1269_v16 = vld [vmem:[%s1457_s9 + $0x70] sm:$0xff]  }
  0x1f   : > { %1193 = vmatprep.mubr.msk.bf16.mxu1 %vm349_vm0, %v1265_v9  ;;  %v1270_v17 = vld [vmem:[%s1457_s9 + $0x78] sm:$0xff]   ;;  %s1367_s9 = smov [#allocation2]  }
  0x20   : > { %s1275_s10 = sshll.u32 %s1367_s9, 4  ;;  %s1276_s10 = int_to_ptr.vmem [resolvable:$false] %s1275_s10 }
  0x21   : > { %s1277_s11 = scalar_lea.vmem %s1276_s10, 32  ;;  %p1278_p0 = scmp.lt.s32.totalorder %s1751_s22, %s1276_s10 }
  0x22   : > { %p1279_p1 = scmp.lt.s32.totalorder %s1277_s11, %s1271_s8 }
  0x24   : > { %1178 = vmatmul.mubr.msk.bf16.gmra.mrb[4].mxu0 %vm349_vm0, %v1258_v5  ;;  %p1280_p2 = por %p1279_p1, %p1278_p0 }
  0x25   : > { %1181 = vmatprep.mubr.msk.bf16.mxu0 %vm349_vm0, %v1259_v6 }
  0x26   : > { %1194 = vmatmul.mubr.msk.bf16.gmra.mrb[4].mxu1 %vm349_vm0, %v1266_v11  ;;  %p1281_p3 = pnand %p1280_p2, %p1274_p13 }
  0x27   : > { %1197 = vmatprep.mubr.msk.bf16.mxu1 %vm349_vm0, %v1267_v13 }
  0x2c   : > { %1182 = vmatmul.mubr.msk.bf16.gmra.mrb[8].mxu0 %vm349_vm0, %v1260_v10 }
  0x2d   : > { %1185 = vmatprep.mubr.msk.bf16.mxu0 %vm349_vm0, %v1261_v12 }
  0x2e   : > { %1198 = vmatmul.mubr.msk.bf16.gmra.mrb[8].mxu1 %vm349_vm0, %v1268_v15 }
  0x2f   : > { %1201 = vmatprep.mubr.msk.bf16.mxu1 %vm349_vm0, %v1269_v16 }
  0x34   : > { %1186 = vmatmul.mubr.msk.bf16.gmra.mrb[12].mxu0 %vm349_vm0, %v1262_v14 }
  0x36   : > { %1202 = vmatmul.mubr.msk.bf16.gmra.mrb[12].mxu1 %vm349_vm0, %v1270_v17 }
  0xef   : > { %v1175_v18 = vpop.f32.mrb[0].mxu0 }
  0xf0   : > { %v1121_v19 = vpack.c.bf16 %v1175_v18, %v1175_v18  ;;  %v432_v20 = vpop.f32.mrb[1].mxu0  ;;  %v794_v24 = vmul.f32 %v1175_v18, %v1175_v18  ;;  %v724_v33 = vsel %vm720_vm2, %v1175_v18, 0.0 }
  0xf1   : > { %v1119_v21 = vpack.c.bf16 %v432_v20, %v432_v20  ;;  %v792_v22 = vmul.f32 %v432_v20, %v432_v20  ;;  %v1176_v23 = vpop.f32.mrb[2].mxu0  ;;  %v721_v27 = vsel %vm720_vm2, %v432_v20, 0.0  ;;  %v1512_v40 = vpop.f32.mrb[0].mxu1 }
  0xf2   : > { %690 = vst.msk [vmem:[%s1496_s12 + $0x8] sm:$0xf] %vm687_vm1, %v1121_v19  ;;  %v1122_v25 = vpack.c.bf16 %v1176_v23, %v1176_v23  ;;  %v435_v26 = vpop.f32.mrb[3].mxu0  ;;  %v795_v31 = vmul.f32 %v1176_v23, %v1176_v23  ;;  %v827_v38 = vsel %vm720_vm2, %v794_v24, 0.0  ;;  %v726_v41 = vsel %vm720_vm2, %v1176_v23, 0.0  ;;  %v1516_v46 = vpop.f32.mrb[1].mxu1 }
  0xf3   : > { %688 = vst.msk [vmem:[%s1496_s12] sm:$0xf] %vm687_vm1, %v1119_v21  ;;  %v1120_v28 = vpack.c.bf16 %v435_v26, %v435_v26  ;;  %v722_v29 = vsel %vm720_vm2, %v435_v26, 0.0  ;;  %v793_v30 = vmul.f32 %v435_v26, %v435_v26  ;;  %v824_v34 = vsel %vm720_vm2, %v792_v22, 0.0  ;;  %v1519_v52 = vpop.f32.mrb[2].mxu1 }
  0xf4   : > { %691 = vst.msk [vmem:[%s1496_s12 + $0xc] sm:$0xf] %vm687_vm1, %v1122_v25  ;;  %v723_v32 = vadd.f32 %v722_v29, %v721_v27  ;;  %v829_v42 = vsel %vm720_vm2, %v795_v31, 0.0  ;;  %v1523_v56 = vpop.f32.mrb[3].mxu1  ;;  %v1137_v0 = vpack.c.bf16 %v1512_v40, %v1512_v40  ;;  %v1135_v5 = vpack.c.bf16 %v1516_v46, %v1516_v46 }
  0xf5   : > { %689 = vst.msk [vmem:[%s1496_s12 + $0x4] sm:$0xf] %vm687_vm1, %v1120_v28  ;;  %v825_v35 = vsel %vm720_vm2, %v793_v30, 0.0  ;;  %v1138_v9 = vpack.c.bf16 %v1519_v52, %v1519_v52 }
  0xf6   : > { %v725_v36 = vadd.f32 %v724_v33, %v723_v32  ;;  %v826_v37 = vadd.f32 %v825_v35, %v824_v34  ;;  %706 = vst.msk [vmem:[%s1496_s12 + $0x48] sm:$0xf] %vm687_vm1, %v1137_v0  ;;  %704 = vst.msk [vmem:[%s1496_s12 + $0x40] sm:$0xf] %vm687_vm1, %v1135_v5 }
  0xf7   : > { %v1179_v39 = vpop.f32.mrb[4].mxu0  ;;  %707 = vst.msk [vmem:[%s1496_s12 + $0x4c] sm:$0xf] %vm687_vm1, %v1138_v9 }
  0xf8   : > { %v828_v43 = vadd.f32 %v827_v38, %v826_v37  ;;  %v1125_v44 = vpack.c.bf16 %v1179_v39, %v1179_v39  ;;  %v448_v45 = vpop.f32.mrb[5].mxu0  ;;  %v727_v48 = vadd.f32 %v726_v41, %v725_v36  ;;  %v798_v57 = vmul.f32 %v1179_v39, %v1179_v39 }
  0xf9   : > { %v1123_v47 = vpack.c.bf16 %v448_v45, %v448_v45  ;;  %v728_v49 = vsel %vm720_vm2, %v448_v45, 0.0  ;;  %v796_v50 = vmul.f32 %v448_v45, %v448_v45  ;;  %v1180_v51 = vpop.f32.mrb[6].mxu0  ;;  %v732_v2 = vsel %vm720_vm2, %v1179_v39, 0.0  ;;  %v1543_v10 = vpop.f32.mrb[4].mxu1 }
  0xfa   : > { %694 = vst.msk [vmem:[%s1496_s12 + $0x18] sm:$0xf] %vm687_vm1, %v1125_v44  ;;  %v830_v53 = vadd.f32 %v829_v42, %v828_v43  ;;  %v1126_v54 = vpack.c.bf16 %v1180_v51, %v1180_v51  ;;  %v451_v55 = vpop.f32.mrb[7].mxu0  ;;  %v729_v58 = vadd.f32 %v728_v49, %v727_v48  ;;  %v799_v3 = vmul.f32 %v1180_v51, %v1180_v51  ;;  %v1549_v15 = vpop.f32.mrb[5].mxu1 }
  0xfb   : > { %692 = vst.msk [vmem:[%s1496_s12 + $0x10] sm:$0xf] %vm687_vm1, %v1123_v47  ;;  %v831_v59 = vsel %vm720_vm2, %v796_v50, 0.0  ;;  %v1124_v60 = vpack.c.bf16 %v451_v55, %v451_v55  ;;  %v730_v62 = vsel %vm720_vm2, %v451_v55, 0.0  ;;  %v797_v63 = vmul.f32 %v451_v55, %v451_v55  ;;  %v1554_v21 = vpop.f32.mrb[6].mxu1 }
  0xfc   : > { %v832_v61 = vadd.f32 %v831_v59, %v830_v53  ;;  %695 = vst.msk [vmem:[%s1496_s12 + $0x1c] sm:$0xf] %vm687_vm1, %v1126_v54  ;;  %v731_v1 = vadd.f32 %v730_v62, %v729_v58  ;;  %v835_v11 = vsel %vm720_vm2, %v798_v57, 0.0  ;;  %v734_v12 = vsel %vm720_vm2, %v1180_v51, 0.0  ;;  %v1559_v26 = vpop.f32.mrb[7].mxu1 }
  0xfd   : > { %693 = vst.msk [vmem:[%s1496_s12 + $0x14] sm:$0xf] %vm687_vm1, %v1124_v60  ;;  %v833_v4 = vsel %vm720_vm2, %v797_v63, 0.0  ;;  %v837_v22 = vsel %vm720_vm2, %v799_v3, 0.0  ;;  %v1136_v39 = vpack.c.bf16 %v1523_v56, %v1523_v56  ;;  %v1141_v44 = vpack.c.bf16 %v1543_v10, %v1543_v10 }
  0xfe   : > { %v733_v6 = vadd.f32 %v732_v2, %v731_v1  ;;  %v834_v7 = vadd.f32 %v833_v4, %v832_v61 }
  0xff   : > { %v1183_v8 = vpop.f32.mrb[8].mxu0  ;;  %705 = vst.msk [vmem:[%s1496_s12 + $0x44] sm:$0xf] %vm687_vm1, %v1136_v39  ;;  %710 = vst.msk [vmem:[%s1496_s12 + $0x58] sm:$0xf] %vm687_vm1, %v1141_v44  ;;  %v754_v39 = vsel %vm720_vm2, %v1523_v56, 0.0 }
 0x100   : > { %v1129_v13 = vpack.c.bf16 %v1183_v8, %v1183_v8  ;;  %v464_v14 = vpop.f32.mrb[9].mxu0  ;;  %v836_v16 = vadd.f32 %v835_v11, %v834_v7  ;;  %v735_v18 = vadd.f32 %v734_v12, %v733_v6  ;;  %v802_v30 = vmul.f32 %v1183_v8, %v1183_v8 }
 0x101   : > { %v1127_v17 = vpack.c.bf16 %v464_v14, %v464_v14  ;;  %v736_v19 = vsel %vm720_vm2, %v464_v14, 0.0  ;;  %v1184_v20 = vpop.f32.mrb[10].mxu0  ;;  %v800_v23 = vmul.f32 %v464_v14, %v464_v14  ;;  %v740_v36 = vsel %vm720_vm2, %v1183_v8, 0.0  ;;  %v1575_v45 = vpop.f32.mrb[8].mxu1 }
 0x102   : > { %698 = vst.msk [vmem:[%s1496_s12 + $0x28] sm:$0xf] %vm687_vm1, %v1129_v13  ;;  %v1130_v24 = vpack.c.bf16 %v1184_v20, %v1184_v20  ;;  %v467_v25 = vpop.f32.mrb[11].mxu0  ;;  %v737_v27 = vadd.f32 %v736_v19, %v735_v18  ;;  %v838_v28 = vadd.f32 %v837_v22, %v836_v16  ;;  %v803_v37 = vmul.f32 %v1184_v20, %v1184_v20  ;;  %v1581_v51 = vpop.f32.mrb[9].mxu1 }
 0x103   : > { %696 = vst.msk [vmem:[%s1496_s12 + $0x20] sm:$0xf] %vm687_vm1, %v1127_v17  ;;  %v1128_v29 = vpack.c.bf16 %v467_v25, %v467_v25  ;;  %v839_v31 = vsel %vm720_vm2, %v800_v23, 0.0  ;;  %v738_v32 = vsel %vm720_vm2, %v467_v25, 0.0  ;;  %v801_v33 = vmul.f32 %v467_v25, %v467_v25  ;;  %v1586_v59 = vpop.f32.mrb[10].mxu1 }
 0x104   : > { %699 = vst.msk [vmem:[%s1496_s12 + $0x2c] sm:$0xf] %vm687_vm1, %v1130_v24  ;;  %v840_v34 = vadd.f32 %v839_v31, %v838_v28  ;;  %v739_v35 = vadd.f32 %v738_v32, %v737_v27  ;;  %v843_v47 = vsel %vm720_vm2, %v802_v30, 0.0  ;;  %v742_v48 = vsel %vm720_vm2, %v1184_v20, 0.0  ;;  %v1591_v0 = vpop.f32.mrb[11].mxu1 }
 0x105   : > { %697 = vst.msk [vmem:[%s1496_s12 + $0x24] sm:$0xf] %vm687_vm1, %v1128_v29  ;;  %v841_v38 = vsel %vm720_vm2, %v801_v33, 0.0  ;;  %v845_v60 = vsel %vm720_vm2, %v803_v37, 0.0  ;;  %v808_v11 = vmul.f32 %v1516_v46, %v1516_v46  ;;  %v1139_v16 = vpack.c.bf16 %v1549_v15, %v1549_v15 }
 0x106   : > { %v741_v41 = vadd.f32 %v740_v36, %v739_v35  ;;  %v842_v42 = vadd.f32 %v841_v38, %v840_v34  ;;  %v1142_v19 = vpack.c.bf16 %v1554_v21, %v1554_v21  ;;  %v752_v24 = vsel %vm720_vm2, %v1516_v46, 0.0 }
 0x107   : > { %v1187_v43 = vpop.f32.mrb[12].mxu0  ;;  %708 = vst.msk [vmem:[%s1496_s12 + $0x50] sm:$0xf] %vm687_vm1, %v1139_v16  ;;  %v1140_v25 = vpack.c.bf16 %v1559_v26, %v1559_v26  ;;  %v855_v32 = vsel %vm720_vm2, %v808_v11, 0.0  ;;  %v809_v46 = vmul.f32 %v1523_v56, %v1523_v56  ;;  %v1145_v33 = vpack.c.bf16 %v1575_v45, %v1575_v45 }
 0x108   : > { %v1133_v49 = vpack.c.bf16 %v1187_v43, %v1187_v43  ;;  %v480_v50 = vpop.f32.mrb[13].mxu0  ;;  %v844_v53 = vadd.f32 %v843_v47, %v842_v42  ;;  %v743_v55 = vadd.f32 %v742_v48, %v741_v41  ;;  %v806_v4 = vmul.f32 %v1187_v43, %v1187_v43  ;;  %711 = vst.msk [vmem:[%s1496_s12 + $0x5c] sm:$0xf] %vm687_vm1, %v1142_v19 }
 0x109   : > { %v1131_v54 = vpack.c.bf16 %v480_v50, %v480_v50  ;;  %v744_v57 = vsel %vm720_vm2, %v480_v50, 0.0  ;;  %v1188_v58 = vpop.f32.mrb[14].mxu0  ;;  %v804_v61 = vmul.f32 %v480_v50, %v480_v50  ;;  %v748_v12 = vsel %vm720_vm2, %v1187_v43, 0.0  ;;  %v1609_v20 = vpop.f32.mrb[12].mxu1  ;;  %709 = vst.msk [vmem:[%s1496_s12 + $0x54] sm:$0xf] %vm687_vm1, %v1140_v25 }
 0x10a   : > { %702 = vst.msk [vmem:[%s1496_s12 + $0x38] sm:$0xf] %vm687_vm1, %v1133_v49  ;;  %v1134_v62 = vpack.c.bf16 %v1188_v58, %v1188_v58  ;;  %v483_v63 = vpop.f32.mrb[15].mxu0  ;;  %v745_v1 = vadd.f32 %v744_v57, %v743_v55  ;;  %v846_v2 = vadd.f32 %v845_v60, %v844_v53  ;;  %v807_v13 = vmul.f32 %v1188_v58, %v1188_v58  ;;  %v1619_v27 = vpop.f32.mrb[13].mxu1 }
 0x10b   : > { %700 = vst.msk [vmem:[%s1496_s12 + $0x30] sm:$0xf] %vm687_vm1, %v1131_v54  ;;  %v1132_v3 = vpack.c.bf16 %v483_v63, %v483_v63  ;;  %v847_v5 = vsel %vm720_vm2, %v804_v61, 0.0  ;;  %v746_v6 = vsel %vm720_vm2, %v483_v63, 0.0  ;;  %v805_v7 = vmul.f32 %v483_v63, %v483_v63  ;;  %v1623_v30 = vpop.f32.mrb[14].mxu1 }
 0x10c   : > { %703 = vst.msk [vmem:[%s1496_s12 + $0x3c] sm:$0xf] %vm687_vm1, %v1134_v62  ;;  %v848_v8 = vadd.f32 %v847_v5, %v846_v2  ;;  %v747_v9 = vadd.f32 %v746_v6, %v745_v1  ;;  %v851_v22 = vsel %vm720_vm2, %v806_v4, 0.0  ;;  %v750_v23 = vsel %vm720_vm2, %v1188_v58, 0.0  ;;  %v1633_v34 = vpop.f32.mrb[15].mxu1 }
 0x10d   : > { %701 = vst.msk [vmem:[%s1496_s12 + $0x34] sm:$0xf] %vm687_vm1, %v1132_v3  ;;  %v849_v14 = vsel %vm720_vm2, %v805_v7, 0.0  ;;  %v853_v31 = vsel %vm720_vm2, %v807_v13, 0.0  ;;  %v1143_v37 = vpack.c.bf16 %v1581_v51, %v1581_v51  ;;  %v810_v38 = vmul.f32 %v1512_v40, %v1512_v40  ;;  %714 = vst.msk [vmem:[%s1496_s12 + $0x68] sm:$0xf] %vm687_vm1, %v1145_v33 }
 0x10e   : > { %v749_v17 = vadd.f32 %v748_v12, %v747_v9  ;;  %v850_v18 = vadd.f32 %v849_v14, %v848_v8  ;;  %v1146_v41 = vpack.c.bf16 %v1586_v59, %v1586_v59  ;;  %v756_v42 = vsel %vm720_vm2, %v1512_v40, 0.0 }
 0x10f   : > { %712 = vst.msk [vmem:[%s1496_s12 + $0x60] sm:$0xf] %vm687_vm1, %v1143_v37  ;;  %v811_v47 = vmul.f32 %v1519_v52, %v1519_v52  ;;  %v857_v48 = vsel %vm720_vm2, %v809_v46, 0.0  ;;  %v812_v56 = vmul.f32 %v1549_v15, %v1549_v15  ;;  %v1144_v49 = vpack.c.bf16 %v1591_v0, %v1591_v0 }
 0x110   : > { %v852_v28 = vadd.f32 %v851_v22, %v850_v18  ;;  %v751_v29 = vadd.f32 %v750_v23, %v749_v17  ;;  %715 = vst.msk [vmem:[%s1496_s12 + $0x6c] sm:$0xf] %vm687_vm1, %v1146_v41  ;;  %v1149_v53 = vpack.c.bf16 %v1609_v20, %v1609_v20  ;;  %v859_v54 = vsel %vm720_vm2, %v810_v38, 0.0 }
 0x111   : > { %v758_v55 = vsel %vm720_vm2, %v1519_v52, 0.0  ;;  %v760_v57 = vsel %vm720_vm2, %v1549_v15, 0.0  ;;  %713 = vst.msk [vmem:[%s1496_s12 + $0x64] sm:$0xf] %vm687_vm1, %v1144_v49  ;;  %v1147_v58 = vpack.c.bf16 %v1619_v27, %v1619_v27  ;;  %v861_v62 = vsel %vm720_vm2, %v811_v47, 0.0 }
 0x112   : > { %v753_v35 = vadd.f32 %v752_v24, %v751_v29  ;;  %v854_v36 = vadd.f32 %v853_v31, %v852_v28  ;;  %718 = vst.msk [vmem:[%s1496_s12 + $0x78] sm:$0xf] %vm687_vm1, %v1149_v53  ;;  %v863_v63 = vsel %vm720_vm2, %v812_v56, 0.0  ;;  %v813_v52 = vmul.f32 %v1559_v26, %v1559_v26 }
 0x113   : > { %716 = vst.msk [vmem:[%s1496_s12 + $0x70] sm:$0xf] %vm687_vm1, %v1147_v58  ;;  %v1150_v15 = vpack.c.bf16 %v1623_v30, %v1623_v30  ;;  %v1148_v3 = vpack.c.bf16 %v1633_v34, %v1633_v34  ;;  %v814_v4 = vmul.f32 %v1543_v10, %v1543_v10  ;;  %v762_v5 = vsel %vm720_vm2, %v1559_v26, 0.0 }
 0x114   : > { %v856_v43 = vadd.f32 %v855_v32, %v854_v36  ;;  %v755_v44 = vadd.f32 %v754_v39, %v753_v35  ;;  %v764_v8 = vsel %vm720_vm2, %v1543_v10, 0.0  ;;  %v815_v9 = vmul.f32 %v1554_v21, %v1554_v21 }
 0x115   : > { %719 = vst.msk [vmem:[%s1496_s12 + $0x7c] sm:$0xf] %vm687_vm1, %v1150_v15  ;;  %717 = vst.msk [vmem:[%s1496_s12 + $0x74] sm:$0xf] %vm687_vm1, %v1148_v3  ;;  %v865_v11 = vsel %vm720_vm2, %v813_v52, 0.0  ;;  %v816_v12 = vmul.f32 %v1581_v51, %v1581_v51  ;;  %v867_v26 = vsel %vm720_vm2, %v814_v4, 0.0  ;;  %v817_v23 = vmul.f32 %v1591_v0, %v1591_v0 }
 0x116   : > { %v757_v40 = vadd.f32 %v756_v42, %v755_v44  ;;  %v858_v50 = vadd.f32 %v857_v48, %v856_v43  ;;  %v766_v16 = vsel %vm720_vm2, %v1554_v21, 0.0  ;;  %v768_v17 = vsel %vm720_vm2, %v1581_v51, 0.0 }
 0x117   : > { %v869_v19 = vsel %vm720_vm2, %v815_v9, 0.0  ;;  %v871_v22 = vsel %vm720_vm2, %v816_v12, 0.0  ;;  %v818_v28 = vmul.f32 %v1575_v45, %v1575_v45  ;;  %v770_v21 = vsel %vm720_vm2, %v1591_v0, 0.0 }
 0x118   : > { %v860_v60 = vadd.f32 %v859_v54, %v858_v50  ;;  %v759_v61 = vadd.f32 %v758_v55, %v757_v40  ;;  %v772_v51 = vsel %vm720_vm2, %v1575_v45, 0.0  ;;  %v819_v32 = vmul.f32 %v1586_v59, %v1586_v59 }
 0x119   : > { %v873_v46 = vsel %vm720_vm2, %v817_v23, 0.0  ;;  %v820_v33 = vmul.f32 %v1619_v27, %v1619_v27  ;;  %v875_v37 = vsel %vm720_vm2, %v818_v28, 0.0  ;;  %v774_v0 = vsel %vm720_vm2, %v1586_v59, 0.0 }
 0x11a   : > { %v761_v1 = vadd.f32 %v760_v57, %v759_v61  ;;  %v862_v2 = vadd.f32 %v861_v62, %v860_v60  ;;  %v776_v38 = vsel %vm720_vm2, %v1619_v27, 0.0  ;;  %v877_v41 = vsel %vm720_vm2, %v819_v32, 0.0 }
 0x11b   : > { %v879_v42 = vsel %vm720_vm2, %v820_v33, 0.0  ;;  %v821_v43 = vmul.f32 %v1633_v34, %v1633_v34  ;;  %v822_v48 = vmul.f32 %v1609_v20, %v1609_v20  ;;  %v778_v59 = vsel %vm720_vm2, %v1633_v34, 0.0 }
 0x11c   : > { %v864_v6 = vadd.f32 %v863_v63, %v862_v2  ;;  %v763_v7 = vadd.f32 %v762_v5, %v761_v1  ;;  %v780_v49 = vsel %vm720_vm2, %v1609_v20, 0.0  ;;  %v823_v40 = vmul.f32 %v1623_v30, %v1623_v30 }
 0x11d   : > { %v881_v50 = vsel %vm720_vm2, %v821_v43, 0.0  ;;  %v883_v55 = vsel %vm720_vm2, %v822_v48, 0.0  ;;  %v782_v57 = vsel %vm720_vm2, %v1623_v30, 0.0 }
 0x11e   : > { %v765_v13 = vadd.f32 %v764_v8, %v763_v7  ;;  %v866_v14 = vadd.f32 %v865_v11, %v864_v6  ;;  %v885_v60 = vsel %vm720_vm2, %v823_v40, 0.0 }
 0x120   : > { %v868_v18 = vadd.f32 %v867_v26, %v866_v14  ;;  %v767_v10 = vadd.f32 %v766_v16, %v765_v13 }
 0x122   : > { %v769_v24 = vadd.f32 %v768_v17, %v767_v10  ;;  %v870_v25 = vadd.f32 %v869_v19, %v868_v18 }
 0x124   : > { %v872_v29 = vadd.f32 %v871_v22, %v870_v25  ;;  %v771_v31 = vadd.f32 %v770_v21, %v769_v24 }
 0x126   : > { %v773_v35 = vadd.f32 %v772_v51, %v771_v31  ;;  %v874_v36 = vadd.f32 %v873_v46, %v872_v29 }
 0x128   : > { %v876_v39 = vadd.f32 %v875_v37, %v874_v36  ;;  %v775_v45 = vadd.f32 %v774_v0, %v773_v35 }
 0x12a   : > { %v777_v44 = vadd.f32 %v776_v38, %v775_v45  ;;  %v878_v47 = vadd.f32 %v877_v41, %v876_v39 }
 0x12c   : > { %v880_v56 = vadd.f32 %v879_v42, %v878_v47  ;;  %v779_v27 = vadd.f32 %v778_v59, %v777_v44 }
 0x12e   : > { %v781_v53 = vadd.f32 %v780_v49, %v779_v27  ;;  %v882_v54 = vadd.f32 %v881_v50, %v880_v56 }
 0x130   : > { %v783_v58 = vadd.f32 %v782_v57, %v781_v53  ;;  %v884_v34 = vadd.f32 %v883_v55, %v882_v54 }
 0x132   : > { %v784_v61 = vrot.slane %v783_v58, 4  ;;  %v886_v62 = vadd.f32 %v885_v60, %v884_v34 }
 0x134   : > { %v785_v20 = vadd.f32 %v784_v61, %v783_v58  ;;  %v887_v63 = vrot.slane %v886_v62, 4 }
 0x136   : > { %v786_v52 = vrot.slane %v785_v20, 2  ;;  %v888_v15 = vadd.f32 %v887_v63, %v886_v62 }
 0x138   : > { %v787_v1 = vadd.f32 %v786_v52, %v785_v20  ;;  %v889_v2 = vrot.slane %v888_v15, 2 }
 0x13a   : > { %v788_v30 = vrot.slane %v787_v1, 1  ;;  %v890_v3 = vadd.f32 %v889_v2, %v888_v15 }
 0x13c   : > { %v789_v4 = vadd.f32 %v788_v30, %v787_v1  ;;  %v891_v5 = vrot.slane %v890_v3, 1 }
 0x13e   : > { %791 = vst.msk [vmem:[%s201_s20] sm:$0x1] %vm790_vm3, %v789_v4  ;;  %v892_v6 = vadd.f32 %v891_v5, %v890_v3 }
 0x13f   : > { %1284 = shalt.err (!%p1281_p3)
}
 0x140   : > { %s1285_s12 = scalar_lea.hbm %s1749_s30, 16  ;;  %s1289_s28 = scalar_lea.hbm %s1828_s3, 32 }
 0x141   : > { %p1286_p4 = scmp.ne.s32.totalorder %s1749_s30, %s1285_s12  ;;  %p1290_p9 = scmp.lt.u32.totalorder %s1749_s30, %s1828_s3 }
 0x142   : > { %p1291_p10 = scmp.lt.u32.totalorder %s1289_s28, %s1285_s12  ;;  %p1293_p12 = scmp.lt.u32.totalorder %s1285_s12, %s1749_s30 }
 0x143   : > { %p1287_p7 = pnand %p1286_p4, %p1432_p5 }
 0x144   : > { %p1292_p11 = por %p1291_p10, %p1290_p9 }
 0x145   : > { %p1288_p8 = pneg %p1287_p7 }
 0x146   : > { %p1294_p13 = por %p1293_p12, %p1292_p11 }
 0x148   : > { %p1295_p0 = pnand %p1294_p13, %p1288_p8 }
 0x14a   : > { %1298 = shalt.err (!%p1295_p0)
}
 0x14b   : > { %1209 = dma.vmem_to_hbm [thread:$0]  (%p1432_p5), %s1751_s22, 16, %s1749_s30, %s900_s7   ;;  %893 = vst.msk [vmem:[%s207_s23] sm:$0x1] %vm790_vm3, %v892_v6 }
 0x14c   : > { %s904_s5 = scalar_lea.sflag [#allocation5], %s1739_s13  ;;  %s1299_s8 = scalar_lea.vmem %s1759_s27, 16 }
 0x14d   : > { %p1300_p1 = scmp.ne.s32.totalorder %s1759_s27, %s1299_s8  ;;  %s1368_s9 = smov [#allocation4]  }
 0x14e   : > { %s1303_s10 = sshll.u32 %s1368_s9, 4  ;;  %s1304_s10 = int_to_ptr.vmem [resolvable:$false] %s1303_s10 }
 0x14f   : > { %p1301_p2 = pnand %p1300_p1, %p1432_p5  ;;  %s1305_s11 = scalar_lea.vmem %s1304_s10, 32 }
 0x150   : > { %p1306_p4 = scmp.lt.s32.totalorder %s1759_s27, %s1304_s10  ;;  %p1307_p7 = scmp.lt.s32.totalorder %s1305_s11, %s1299_s8 }
 0x151   : > { %p1302_p3 = pneg %p1301_p2 }
 0x152   : > { %p1308_p8 = por %p1307_p7, %p1306_p4 }
 0x154   : > { %p1309_p9 = pnand %p1308_p8, %p1302_p3 }
 0x156   : > { %1312 = shalt.err (!%p1309_p9)
}
 0x157   : > { %s1313_s13 = scalar_lea.hbm %s1757_s6, 16  ;;  %s1317_s30 = scalar_lea.hbm %s1829_s4, 32 }
 0x158   : > { %p1314_p10 = scmp.ne.s32.totalorder %s1757_s6, %s1313_s13  ;;  %p1318_p13 = scmp.lt.u32.totalorder %s1757_s6, %s1829_s4 }
 0x159   : > { %p1319_p0 = scmp.lt.u32.totalorder %s1317_s30, %s1313_s13  ;;  %p1321_p2 = scmp.lt.u32.totalorder %s1313_s13, %s1757_s6 }
 0x15a   : > { %p1315_p11 = pnand %p1314_p10, %p1432_p5 }
 0x15b   : > { %p1320_p1 = por %p1319_p0, %p1318_p13 }
 0x15c   : > { %p1316_p12 = pneg %p1315_p11 }
 0x15d   : > { %p1322_p3 = por %p1321_p2, %p1320_p1 }
 0x15f   : > { %p1323_p4 = pnand %p1322_p3, %p1316_p12 }
 0x161   : > { %1326 = shalt.err (!%p1323_p4)
}
 0x162   : > { %1210 = dma.vmem_to_hbm [thread:$0]  (%p1432_p5), %s1759_s27, 16, %s1757_s6, %s904_s5  }
 0x163 PF: > { %p1220_p7 = scmp.ge.s32.totalorder %s1365_s18, 2  ;;  %s953_s14 = sand.u32 1, %s1353_s15  }
 0x164   : > { %s954_s20 = scalar_lea.sflag [#allocation3], %s953_s14 }
 0x165   : > { %p1214_p8 = pnand %p1220_p7, %p1436_p6 }
 0x167   : > { %1344 = dma.done.wait (!%p1214_p8), %s954_s20, 16  }
 0x168   : > { %1346 = vsyncadd (!%p1214_p8), %s954_s20, 4294967280  ;;  %s962_s28 = scalar_lea.sflag [#allocation5], %s953_s14 }
 0x169   : > { %1348 = dma.done.wait (!%p1214_p8), %s962_s28, 16  }
 0x16a   : > { %1350 = vsyncadd (!%p1214_p8), %s962_s28, 4294967280  ;;  %p18_p5 = scmp.ge.s32.totalorder %s1419_s21, 4   ;;  %s1832_s15 = smov %s1357_s16 }
 0x16b   : > { %s1833_s16 = smov %s1361_s17  ;;  %s1834_s17 = smov %s1430_s24 }
 0x16c   : > { %s1835_s18 = smov %s1419_s21  ;;  %20 = sbr.rel (!%p18_p5) target bundleno = 5 (0x5), region = 92 }
 0x173   :  { %966 = vsyncpa [#allocation3], 1 }
 0x174   :  { %968 = vsyncpa [#allocation3 + $0x1], 1 }
 0x175   :  { %969 = vsyncpa [#allocation5], 1 }
 0x176   :  { %971 = vsyncpa [#allocation5 + $0x1], 1 }

</bundles_post_ra>
